<compile_context>
chip_gen: v7x
topology: tpu7x:2x2x1
jax: 0.10.0
libtpu: 0.0.40
codegen_flags: <defaults>
</compile_context>

<pallas_src>
import functools

import jax
import jax.numpy as jnp
from jax.experimental import pallas as pl
from jax.experimental.pallas import tpu as pltpu


def _round_up(x, m):
    return ((x + m - 1) // m) * m


def _channel_tile(c, unit, max_tile):
    """Largest divisor of `c` that is a multiple of `unit` and <= max_tile.

    Falls back to the full dimension (untiled), which always satisfies the
    TPU (8, 128) block constraints."""
    if c <= max_tile:
        return c
    t = (max_tile // unit) * unit
    while t >= unit:
        if c % t == 0:
            return t
        t -= unit
    return c


def _sepconv1d_kernel(*refs, kernel_size, stride):
    """One (batch, length-tile, c_out-tile) grid step.

    refs = [phase0_cur, phase0_nxt, ..., phase{s-1}_cur, phase{s-1}_nxt,
            w_dw, w_pw, b_eff, out, dw_scratch]
    """
    n_x = 2 * stride
    x_refs = refs[:n_x]
    wdw_ref, wpw_ref, bias_ref, o_ref, dw_ref = refs[n_x:]

    co = pl.program_id(2)
    tl = dw_ref.shape[1]

    # ---- depthwise FIR: computed once per (batch, L-tile) ------------------
    # The c_out axis is innermost + "arbitrary"; the x block indices ignore it,
    # so the x tiles stay resident and this branch runs only on the first
    # c_out stripe.  Taps are built from a [cur | next] lane halo, so every
    # HBM access is a unit-stride block load (no materialized shifted copies).
    @pl.when(co == 0)
    def _():
        w_dw = wdw_ref[...].astype(jnp.float32)                  # (c_in, K)
        wins = []
        for p in range(stride):
            cur = x_refs[2 * p][0].astype(jnp.float32)           # (c_in, TL)
            nxt = x_refs[2 * p + 1][0].astype(jnp.float32)       # (c_in, TL)
            wins.append(jnp.concatenate([cur, nxt], axis=-1))    # (c_in, 2TL)
        acc = None
        for k in range(kernel_size):
            p, d = k % stride, k // stride
            tap = wins[p][:, d:d + tl]          # static shifted window (XLU)
            term = tap * w_dw[:, k:k + 1]       # f32 VPU FMA (v5e-safe)
            acc = term if acc is None else acc + term
        dw_ref[...] = acc.astype(dw_ref.dtype)  # bf16 scratch for bf16 models

    # ---- pointwise 1x1: (tc_out, c_in) @ (c_in, TL) on the MXU -------------
    out = jnp.dot(wpw_ref[...], dw_ref[...], preferred_element_type=jnp.float32)
    out = out + bias_ref[...]                   # folded (b_pw + W_pw @ b_dw), f32
    o_ref[0] = out.astype(o_ref.dtype)


def separable_conv1d(x, w_dw, b_dw, w_pw, b_pw, *, stride, padding,
                     max_lane_tile=512, max_cout_tile=256,
                     vmem_budget_bytes=24 << 20):
    """Fused depthwise + pointwise Conv1d (PyTorch SeparableConv1d semantics).

    x: (N, C_in, L); w_dw: (C_in, K); b_dw: (C_in,);
    w_pw: (C_out, C_in); b_pw: (C_out,).  Returns (N, C_out, L_out)."""
    n, c_in, length = x.shape
    c_out = w_pw.shape[0]
    k = w_dw.shape[1]
    s = int(stride)
    l_out = (length + 2 * padding - k) // s + 1
    assert l_out > 0

    # Fold the depthwise bias into the pointwise bias (1x1 conv is linear):
    # pointwise(dw + b_dw) = W_pw @ dw + (W_pw @ b_dw + b_pw).  Keep it in f32.
    b_eff = (b_pw.astype(jnp.float32)
             + w_pw.astype(jnp.float32) @ b_dw.astype(jnp.float32)
             ).reshape(c_out, 1)

    x_isize = jnp.dtype(x.dtype).itemsize
    w_isize = jnp.dtype(w_pw.dtype).itemsize
    dw_dtype = jnp.bfloat16 if x.dtype == jnp.bfloat16 else jnp.float32

    # Lane-dense length tiling (multiples of 128) and output-channel stripes.
    tile_l = max(128, min(_round_up(max_lane_tile, 128), _round_up(l_out, 128)))
    tc_out = _channel_tile(c_out, 8, max_cout_tile)

    def vmem_estimate(tl, tco):
        io = 2 * (2 * s * c_in * tl * x_isize      # x cur/nxt per phase (2-buf)
                  + c_in * k * w_isize             # w_dw
                  + tco * c_in * w_isize           # w_pw stripe
                  + tco * 4                        # folded bias
                  + tco * tl * x_isize)            # output tile
        scratch = c_in * tl * jnp.dtype(dw_dtype).itemsize
        temps = (2 * s + 1) * c_in * tl * 4        # f32 halo windows + FIR acc
        return io + scratch + temps

    # Keep the per-step footprint under budget (v7x has the smallest VMEM):
    # shrink the C_out stripe first, then the lane tile (never below 128).
    while vmem_estimate(tile_l, tc_out) > vmem_budget_bytes and tc_out > 128:
        nt = _channel_tile(c_out, 8, max(8, tc_out // 2))
        if nt >= tc_out:
            break
        tc_out = nt
    while vmem_estimate(tile_l, tc_out) > vmem_budget_bytes and tile_l > 128:
        tile_l = max(128, _round_up(tile_l // 2, 128))

    l_out_pad = _round_up(l_out, tile_l)
    n_l = l_out_pad // tile_l
    n_co = c_out // tc_out

    # One zero-padded copy of x, stride-deinterleaved into `s` phase arrays
    # (for the stride=1 case used throughout Xception this is a single array):
    # phase[p][:, :, j] == x_pad_conv[:, :, j*stride + p].  Each phase is
    # padded to l_out_pad + tile_l lanes so the halo ("next") block exists.
    lx = s * (l_out_pad + tile_l)
    x_pad = jnp.pad(x, ((0, 0), (0, 0), (padding, lx - length - padding)))
    phases = [x_pad[:, :, p::s] for p in range(s)] if s > 1 else [x_pad]

    x_cur_spec = pl.BlockSpec((1, c_in, tile_l), lambda b, l, co: (b, 0, l))
    x_nxt_spec = pl.BlockSpec((1, c_in, tile_l), lambda b, l, co: (b, 0, l + 1))
    in_specs, x_args = [], []
    for p in range(s):
        in_specs += [x_cur_spec, x_nxt_spec]
        x_args += [phases[p], phases[p]]
    in_specs += [
        pl.BlockSpec((c_in, k), lambda b, l, co: (0, 0)),
        pl.BlockSpec((tc_out, c_in), lambda b, l, co: (co, 0)),
        pl.BlockSpec((tc_out, 1), lambda b, l, co: (co, 0)),
    ]
    out_spec = pl.BlockSpec((1, tc_out, tile_l), lambda b, l, co: (b, co, l))

    cost = pl.CostEstimate(
        flops=int(2 * n * l_out * c_in * (k + c_out)),
        transcendentals=0,
        bytes_accessed=int(
            n * n_l * 2 * s * c_in * tile_l * x_isize                   # x (cur+nxt)
            + n * n_l * n_co * (tc_out * c_in * w_isize + tc_out * 4)   # w_pw + bias
            + c_in * k * w_isize                                        # w_dw
            + n * c_out * l_out_pad * x_isize))                         # output

    est = vmem_estimate(tile_l, tc_out)
    vmem_limit = int(min(56 << 20, max(32 << 20, est + (8 << 20))))

    kernel = functools.partial(_sepconv1d_kernel, kernel_size=k, stride=s)

    out = pl.pallas_call(
        kernel,
        out_shape=jax.ShapeDtypeStruct((n, c_out, l_out_pad), x.dtype),
        grid_spec=pltpu.PrefetchScalarGridSpec(
            num_scalar_prefetch=0,
            grid=(n, n_l, n_co),
            in_specs=in_specs,
            out_specs=out_spec,
            scratch_shapes=[pltpu.VMEM((c_in, tile_l), dw_dtype)],
        ),
        compiler_params=pltpu.CompilerParams(
            dimension_semantics=("parallel", "parallel", "arbitrary"),
            vmem_limit_bytes=vmem_limit),
        cost_estimate=cost,
    )(*x_args, w_dw, w_pw, b_eff)

    return out[:, :, :l_out]


def _reference(x, w_dw, b_dw, w_pw, b_pw, *, stride, padding):
    """Pure-JAX reference matching PyTorch Conv1d semantics."""
    dw = jax.lax.conv_general_dilated(
        x, w_dw[:, None, :],                       # (C_in, 1, K)
        window_strides=(stride,), padding=[(padding, padding)],
        dimension_numbers=("NCH", "OIH", "NCH"),
        feature_group_count=x.shape[1],
        precision=jax.lax.Precision.HIGHEST)
    dw = dw + b_dw[None, :, None]
    pw = jax.lax.conv_general_dilated(
        dw, w_pw[:, :, None],                      # (C_out, C_in, 1)
        window_strides=(1,), padding=[(0, 0)],
        dimension_numbers=("NCH", "OIH", "NCH"),
        precision=jax.lax.Precision.HIGHEST)
    return pw + b_pw[None, :, None]


def _run_case(key, *, n, c_in, c_out, length, k, stride, padding, **kw):
    kx, k1, k2, k3, k4 = jax.random.split(key, 5)
    x = jax.random.normal(kx, (n, c_in, length), dtype=jnp.float32)
    w_dw = jax.random.normal(k1, (c_in, k), dtype=jnp.float32) * 0.1
    b_dw = jax.random.normal(k2, (c_in,), dtype=jnp.float32) * 0.1
    w_pw = jax.random.normal(k3, (c_out, c_in), dtype=jnp.float32) * 0.1
    b_pw = jax.random.normal(k4, (c_out,), dtype=jnp.float32) * 0.1

    out = separable_conv1d(x, w_dw, b_dw, w_pw, b_pw,
                           stride=stride, padding=padding, **kw)
    out = jax.block_until_ready(out)

    ref = _reference(x, w_dw, b_dw, w_pw, b_pw, stride=stride, padding=padding)
    assert out.shape == ref.shape, (out.shape, ref.shape)
    err = float(jnp.max(jnp.abs(out - ref)))
    assert jnp.allclose(out, ref, atol=1e-4, rtol=1e-4), f"mismatch, max err {err}"


if __name__ == "__main__":
    key = jax.random.PRNGKey(0)
    key1, key2, key3 = jax.random.split(key, 3)
    # SeparableConv1d(4 -> 8, k=3, stride=1, pad=1): the configuration used
    # throughout the Xception entry / middle / exit flows (all stride 1).
    _run_case(key1, n=2, c_in=4, c_out=8, length=16, k=3, stride=1, padding=1)
    # Multi L-tile (halo across tile boundary) + multi C_out-stripe path
    # (exercises the dw-scratch reuse across the innermost c_out axis).
    _run_case(key2, n=2, c_in=8, c_out=16, length=200, k=3, stride=1, padding=1,
              max_lane_tile=128, max_cout_tile=8)
    # Stride-2 variant exercises the stride-phase deinterleave path.
    _run_case(key3, n=2, c_in=8, c_out=16, length=32, k=3, stride=2, padding=1)
    print("KERNEL_OK")
</pallas_src>

<mosaic_0001>
module attributes {stable_mosaic.version = 11 : i64} {
  func.func @_sepconv1d_kernel(%arg0: i32, %arg1: i32, %arg2: i32, %arg3: memref<1x4x128xf32, #tpu.memory_space<vmem>>, %arg4: memref<1x4x128xf32, #tpu.memory_space<vmem>>, %arg5: memref<4x3xf32, #tpu.memory_space<vmem>>, %arg6: memref<8x4xf32, #tpu.memory_space<vmem>>, %arg7: memref<8x1xf32, #tpu.memory_space<vmem>>, %arg8: memref<1x8x128xf32, #tpu.memory_space<vmem>>, %arg9: memref<4x128xf32, #tpu.memory_space<vmem>>) attributes {dimension_semantics = [#tpu.dimension_semantics<parallel>, #tpu.dimension_semantics<parallel>, #tpu.dimension_semantics<arbitrary>], iteration_bounds = array<i64: 2, 1, 1>, scalar_prefetch = 0 : i64, scratch_operands = 1 : i64, tpu.core_type = #tpu.core_type<tc>, window_params = [{transform_indices = @transform_0, window_bounds = array<i64: 1, 4, 128>}, {transform_indices = @transform_1, window_bounds = array<i64: 1, 4, 128>}, {pipeline_mode = #tpu.pipeline_mode<synchronous>, transform_indices = @transform_2, window_bounds = array<i64: 4, 3>}, {transform_indices = @transform_3, window_bounds = array<i64: 8, 4>}, {transform_indices = @transform_4, window_bounds = array<i64: 8, 1>}, {transform_indices = @transform_5, window_bounds = array<i64: 1, 8, 128>}]} {
    %c0_i32 = arith.constant 0 : i32
    %0 = arith.cmpi eq, %arg2, %c0_i32 : i32
    %1 = arith.extui %0 : i1 to i32
    %c0_i32_0 = arith.constant 0 : i32
    %2 = arith.cmpi ne, %1, %c0_i32_0 : i32
    scf.if %2 {
      %c0_9 = arith.constant 0 : index
      %c0_10 = arith.constant 0 : index
      %12 = vector.load %arg5[%c0_9, %c0_10] : memref<4x3xf32, #tpu.memory_space<vmem>>, vector<4x3xf32>
      %c0_11 = arith.constant 0 : index
      %c0_12 = arith.constant 0 : index
      %c0_13 = arith.constant 0 : index
      %13 = vector.load %arg3[%c0_11, %c0_12, %c0_13] : memref<1x4x128xf32, #tpu.memory_space<vmem>>, vector<1x4x128xf32>
      %14 = vector.shape_cast %13 : vector<1x4x128xf32> to vector<4x128xf32>
      %c0_14 = arith.constant 0 : index
      %c0_15 = arith.constant 0 : index
      %c0_16 = arith.constant 0 : index
      %15 = vector.load %arg4[%c0_14, %c0_15, %c0_16] : memref<1x4x128xf32, #tpu.memory_space<vmem>>, vector<1x4x128xf32>
      %16 = vector.shape_cast %15 : vector<1x4x128xf32> to vector<4x128xf32>
      %17 = tpu.concatenate %14, %16 in 1 : vector<4x128xf32>, vector<4x128xf32> -> vector<4x256xf32>
      %18 = vector.extract_strided_slice %17 {offsets = [0, 0], sizes = [4, 128], strides = [1, 1]} : vector<4x256xf32> to vector<4x128xf32>
      %19 = vector.extract_strided_slice %12 {offsets = [0, 0], sizes = [4, 1], strides = [1, 1]} : vector<4x3xf32> to vector<4x1xf32>
      %20 = vector.broadcast %19 : vector<4x1xf32> to vector<4x128xf32>
      %21 = arith.mulf %18, %20 : vector<4x128xf32>
      %22 = vector.extract_strided_slice %17 {offsets = [0, 1], sizes = [4, 128], strides = [1, 1]} : vector<4x256xf32> to vector<4x128xf32>
      %23 = vector.extract_strided_slice %12 {offsets = [0, 1], sizes = [4, 1], strides = [1, 1]} : vector<4x3xf32> to vector<4x1xf32>
      %24 = vector.broadcast %23 : vector<4x1xf32> to vector<4x128xf32>
      %25 = arith.mulf %22, %24 : vector<4x128xf32>
      %26 = arith.addf %21, %25 : vector<4x128xf32>
      %27 = vector.extract_strided_slice %17 {offsets = [0, 2], sizes = [4, 128], strides = [1, 1]} : vector<4x256xf32> to vector<4x128xf32>
      %28 = vector.extract_strided_slice %12 {offsets = [0, 2], sizes = [4, 1], strides = [1, 1]} : vector<4x3xf32> to vector<4x1xf32>
      %29 = vector.broadcast %28 : vector<4x1xf32> to vector<4x128xf32>
      %30 = arith.mulf %27, %29 : vector<4x128xf32>
      %31 = arith.addf %26, %30 : vector<4x128xf32>
      %c0_17 = arith.constant 0 : index
      %c0_18 = arith.constant 0 : index
      %32 = vector.load %arg9[%c0_17, %c0_18] : memref<4x128xf32, #tpu.memory_space<vmem>>, vector<4x128xf32>
      tpu.vector_store %arg9[%c0_17, %c0_18], %31 {strides = array<i32>} : memref<4x128xf32, #tpu.memory_space<vmem>>, vector<4x128xf32>,
    } else {
    }
    %c0 = arith.constant 0 : index
    %c0_1 = arith.constant 0 : index
    %3 = vector.load %arg6[%c0, %c0_1] : memref<8x4xf32, #tpu.memory_space<vmem>>, vector<8x4xf32>
    %c0_2 = arith.constant 0 : index
    %c0_3 = arith.constant 0 : index
    %4 = vector.load %arg9[%c0_2, %c0_3] : memref<4x128xf32, #tpu.memory_space<vmem>>, vector<4x128xf32>
    %cst = arith.constant dense<0.000000e+00> : vector<8x128xf32>
    %5 = tpu.matmul %3, %4, %cst {dimension_numbers = #tpu.dot_dimension_numbers<[1], [0], [0], [1], [0, 0, 1, 1], [], []>} : vector<8x4xf32>, vector<4x128xf32>, vector<8x128xf32> -> vector<8x128xf32>
    %c0_4 = arith.constant 0 : index
    %c0_5 = arith.constant 0 : index
    %6 = vector.load %arg7[%c0_4, %c0_5] : memref<8x1xf32, #tpu.memory_space<vmem>>, vector<8x1xf32>
    %7 = vector.broadcast %6 : vector<8x1xf32> to vector<8x128xf32>
    %8 = arith.addf %5, %7 : vector<8x128xf32>
    %c0_6 = arith.constant 0 : index
    %c0_7 = arith.constant 0 : index
    %c0_8 = arith.constant 0 : index
    %9 = vector.load %arg8[%c0_6, %c0_7, %c0_8] : memref<1x8x128xf32, #tpu.memory_space<vmem>>, vector<1x8x128xf32>
    %10 = vector.shape_cast %9 : vector<1x8x128xf32> to vector<8x128xf32>
    %11 = vector.shape_cast %8 : vector<8x128xf32> to vector<1x8x128xf32>
    tpu.vector_store %arg8[%c0_6, %c0_7, %c0_8], %11 {strides = array<i32>} : memref<1x8x128xf32, #tpu.memory_space<vmem>>, vector<1x8x128xf32>,
    return
  }
  func.func @transform_0(%arg0: i32, %arg1: i32, %arg2: i32) -> (i32, i32, i32) {
    %c0_i32 = arith.constant 0 : i32
    %c0_i32_0 = arith.constant 0 : i32
    return %arg0, %c0_i32, %arg1 : i32, i32, i32
  }
  func.func @transform_1(%arg0: i32, %arg1: i32, %arg2: i32) -> (i32, i32, i32) {
    %c1_i32 = arith.constant 1 : i32
    %0 = arith.addi %arg1, %c1_i32 : i32
    %c0_i32 = arith.constant 0 : i32
    %c0_i32_0 = arith.constant 0 : i32
    return %arg0, %c0_i32, %0 : i32, i32, i32
  }
  func.func @transform_2(%arg0: i32, %arg1: i32, %arg2: i32) -> (i32, i32) {
    %c0_i32 = arith.constant 0 : i32
    %c0_i32_0 = arith.constant 0 : i32
    %c0_i32_1 = arith.constant 0 : i32
    return %c0_i32, %c0_i32_0 : i32, i32
  }
  func.func @transform_3(%arg0: i32, %arg1: i32, %arg2: i32) -> (i32, i32) {
    %c0_i32 = arith.constant 0 : i32
    %c0_i32_0 = arith.constant 0 : i32
    return %arg2, %c0_i32 : i32, i32
  }
  func.func @transform_4(%arg0: i32, %arg1: i32, %arg2: i32) -> (i32, i32) {
    %c0_i32 = arith.constant 0 : i32
    %c0_i32_0 = arith.constant 0 : i32
    return %arg2, %c0_i32 : i32, i32
  }
  func.func @transform_5(%arg0: i32, %arg1: i32, %arg2: i32) -> (i32, i32, i32) {
    %c0_i32 = arith.constant 0 : i32
    return %arg0, %arg2, %arg1 : i32, i32, i32
  }
}

</mosaic_0001>

<bundles_post_ra>
// kernel: tpu_custom_call.1
= control target key start
LH: loop header
LB: loop body
LE: loop exit
PB: predicated region body
PF: predicated region fallthrough
CT: control target
= control target key end

     0   :  { %10 = vsyncpa [#allocation4], 0  ;;  %s1061_s0 = inlined_call_operand.vmem [shape: f32[2,4,256], index: 0, kind: input, shape index: {}]   ;;  %s1062_s1 = inlined_call_operand.hbm [shape: f32[2,4,256], index: 1, kind: input, shape index: {}]   ;;  %s1063_s2 = inlined_call_operand.vmem [shape: f32[4,3], index: 2, kind: input, shape index: {}]   ;;  %s1064_s3 = inlined_call_operand.vmem [shape: f32[8,4], index: 3, kind: input, shape index: {}]   ;;  %s1065_s4 = inlined_call_operand.vmem [shape: f32[8,1], index: 4, kind: input, shape index: {}]   ;;  %s1066_s5 = inlined_call_operand.hbm [shape: f32[2,8,128], index: 5, kind: output, shape index: {}]  }
   0x1   :  { %12 = vsyncpa [#allocation4 + $0x1], 0 }
   0x2   :  { %13 = vsyncpa [#allocation5], 0 }
   0x3   :  { %15 = vsyncpa [#allocation5 + $0x1], 0  ;;  %s875_s18 = smov 0   ;;  %s877_s19 = smov 0  }
   0x4   :  { %s879_s20 = smov 0   ;;  %s881_s21 = smov 0  }
   0x5   :  { %s883_s22 = smov 0   ;;  %s885_s23 = smov 0  }
   0x6 LB: > { %s619_s24 = sadd.s32 4294967295, %s834_s23   ;;  %s620_s25 = sadd.s32 4294967294, %s834_s23   ;;  %s834_s23 = sphi %s885_s23, %s21_s23   ;;  %s830_s22 = sphi %s883_s22, %s1082_s22   ;;  %s826_s21 = sphi %s881_s21, %s1081_s21   ;;  %s822_s20 = sphi %s879_s20, %s1080_s20   ;;  %s818_s19 = sphi %s877_s19, %s1079_s19   ;;  %s814_s18 = sphi %s875_s18, %s1078_s18  }
   0x7   : > { %s40_s26 = sadd.s32 1, %s830_s22  ;;  %s79_s27 = sadd.s32 1, %s822_s20 }
   0x8   : > { %p42_p0 = scmp.ge.s32.totalorder %s40_s26, 2  ;;  %p86_p1 = scmp.ne.s32.totalorder %s822_s20, %s818_s19 }
   0x9   : > { %p87_p2 = scmp.eq.s32.totalorder %s834_s23, 0  ;;  %p92_p3 = scmp.ne.s32.totalorder %s818_s19, %s814_s18 }
   0xa   : > { %s1084_s26 = smov (%p42_p0, %s40_s26), 0  ;;  %p93_p5 = scmp.eq.s32.totalorder %s619_s24, 0 }
   0xb   : > { %p916_p4 = por %p87_p2, %p86_p1  ;;  %s74_s29 = ssub.s32 %s830_s22, %s1084_s26 }
   0xc   : > { %p193_p6 = scmp.eq.s32.totalorder %s619_s24, 1  ;;  %p77_p7 = scmp.eq.s32.totalorder %s74_s29, 0 }
   0xd   : > { %p922_p8 = por %p93_p5, %p92_p3  ;;  %p199_p10 = scmp.eq.s32.totalorder %s620_s25, 1 }
   0xe   : > { %p926_p9 = por %p193_p6, %p86_p1  ;;  %p660_p13 = scmp.lt.s32.totalorder %s834_s23, 2 }
   0xf   : > { %s931_s7 = scalar_select %p77_p7, %s822_s20, %s79_s27  }
  0x10   : > { %s1070_s6 = scalar_select %p926_p9, 1, 0 }
  0x11   : > { %p933_p11 = por %p199_p10, %p92_p3  ;;  %s247_s9 = sand.u32 1, %s822_s20  }
  0x12   : > { %s625_s10 = sshll.u32 %s247_s9, 2  ;;  %s639_s11 = sshll.u32 %s830_s22, 7 }
  0x13   : > { %s1071_s8 = scalar_select %p933_p11, 1, 0 }
  0x14   : > { %s523_s14 = scalar_lea.hbm %s1062_s1, %s639_s11  ;;  %s251_s15 = scalar_lea.vmem [#allocation3], %s625_s10 }
  0x15   : > { %s261_s16 = sshll.u32 %s251_s15, 4  ;;  %s944_s17 = scalar_lea.hbm %s523_s14, 64  ;;  %s946_s16 = int_to_ptr.vmem [resolvable:$true] %s261_s16 }
  0x16   : > { %p950_p0 = pnand %p660_p13, %p916_p4  ;;  %s248_s25 = scalar_lea.sflag [#allocation4], %s247_s9 }
  0x17   : > { %s751_s27 = scalar_lea.hbm %s523_s14, 128  ;;  %s726_s28 = scalar_lea.hbm %s1062_s1, 256 }
  0x18   : > { %p722_p3 = scmp.ne.s32.totalorder %s944_s17, %s751_s27  ;;  %p723_p5 = pneg %p950_p0 }
  0x19   : > { %p727_p4 = scmp.lt.u32.totalorder %s944_s17, %s1062_s1  ;;  %p728_p10 = scmp.lt.u32.totalorder %s726_s28, %s751_s27 }
  0x1a   : > { %p724_p6 = pnand %p723_p5, %p722_p3  ;;  %p730_p12 = scmp.lt.u32.totalorder %s751_s27, %s944_s17 }
  0x1b   : > { %p729_p13 = por %p728_p10, %p727_p4 }
  0x1c   : > { %p725_p7 = pneg %p724_p6 }
  0x1d   : > { %p731_p1 = por %p730_p12, %p729_p13 }
  0x1f   : > { %p732_p2 = pnand %p731_p1, %p725_p7 }
  0x21   : > { %735 = shalt.err (!%p732_p2)
}
  0x22   : > { %s736_s9 = scalar_lea.vmem %s946_s16, 64  ;;  %s836_s13 = smov [#allocation3]  }
  0x23   : > { %p737_p3 = scmp.ne.s32.totalorder %s946_s16, %s736_s9  ;;  %s741_s14 = sshll.u32 %s836_s13, 4  ;;  %s742_s14 = int_to_ptr.vmem [resolvable:$false] %s741_s14 }
  0x24   : > { %s743_s15 = scalar_lea.vmem %s742_s14, 128  ;;  %p744_p9 = scmp.lt.s32.totalorder %s946_s16, %s742_s14 }
  0x25   : > { %p739_p6 = pnand %p737_p3, %p723_p5  ;;  %p745_p4 = scmp.lt.s32.totalorder %s743_s15, %s736_s9 }
  0x27   : > { %p740_p11 = pneg %p739_p6  ;;  %p746_p10 = por %p745_p4, %p744_p9 }
  0x29   : > { %p747_p12 = pnand %p746_p10, %p740_p11 }
  0x2b   : > { %750 = shalt.err (!%p747_p12)
}
  0x2c   : > { %655 = dma.hbm_to_vmem [thread:$0]  (!%p950_p0), %s944_s17, 64, %s946_s16, %s248_s25  }
  0x2d   : > { %p1073_p1 = scmp.lt.s32.totalorder %s834_s23, 3  ;;  %p1074_p2 = scmp.ge.s32.totalorder %s834_s23, 1 }
  0x2f   : > { %p267_p5 = pnand %p1074_p2, %p1073_p1 }
  0x30   : > { %s985_s27 = sand.u32 (!%p267_p5), 1, %s818_s19  }
  0x31   : > { %270 = sbr.rel (%p267_p5) target bundleno = 552 (0x228), region = 40  ;;  %s629_s29 = sshll.u32 (!%p267_p5), %s985_s27, 2 }
  0x32   : > { %s273_s10 = scalar_lea.sflag (!%p267_p5), [#allocation4], %s985_s27  ;;  %s276_s28 = scalar_lea.vmem (!%p267_p5), [#allocation3], %s629_s29 }
  0x38   : > { %805 = dma.done.wait (%p922_p8), %s273_s10, 64  }
  0x39   : > { %807 = vsyncadd (%p922_p8), %s273_s10, 4294967232  ;;  %v837_v0 = vmov 1   ;;  %v838_v1 = vmov 0   ;;  %v340_v2 = vld [vmem:[%s1063_s2] sm:$0xf]  ;;  %v839_v3 = vmov 2  }
  0x3a   : > { %717 = vset.pattern.permute.xlu0 %v837_v0  ;;  %719 = vset.pattern.permute.xlu1 %v838_v1  ;;  %p319_p9 = scmp.lt.s32.totalorder %s826_s21, 1  ;;  %v342_v7 = vld [vmem:[%s276_s28] sm:$0xf]  ;;  %v840_v8 = vmov 0.0   ;;  %s841_s9 = smov 127   ;;  %vm843_vm0 = vmmov 0  }
  0x3b   : > { %350 = vperm.xlu0 %717, %v340_v2   ;;  %345 = vperm.xlu1 %719, %v340_v2   ;;  %s842_s13 = smov 126   ;;  %v384_v13 = vld [vmem:[%s1065_s4] sm:$0xff]  ;;  %vm361_vm1 = vcmask 1039360   ;;  %vm377_vm2 = vcmask 1031168   ;;  %vm394_vm3 = vcmask 1043456   ;;  %vm390_vm4 = vcmask 31744  }
  0x3c   : > { %s320_s24 = scalar_select %p319_p9, %s826_s21, 1  ;;  %643 = vmatprep.subr.mxu0 %v840_v8  ;;  %645 = vmatprep.mubr.msk.f32.mxu0 %vm843_vm0, %v840_v8  ;;  %v382_v24 = vld [vmem:[%s1064_s3] sm:$0xff] }
  0x3d   : > { %s630_s28 = sshll.u32 %s985_s27, 3  ;;  %s636_s16 = sshll.u32 %s826_s21, 7 }
  0x3e   : > { %s640_s30 = sshll.u32 %s320_s24, 3  ;;  %s318_s17 = scalar_lea.vmem [#allocation6], %s630_s28 }
  0x3f   : > { %718 = vset.pattern.permute.xlu0 %v839_v3  ;;  %s326_s12 = scalar_lea.vmem %s1061_s0, %s640_s30  ;;  %s485_s24 = sshll.u32 %s318_s17, 4  ;;  %s1014_s24 = int_to_ptr.vmem [resolvable:$true] %s485_s24 }
  0x40   : > { %366 = vperm.xlu0 %718, %v340_v2   ;;  %v341_v4 = vld [vmem:[%s326_s12] sm:$0xf]  ;;  %s1012_s11 = scalar_lea.hbm %s1066_s5, %s636_s16  ;;  %s470_s12 = scalar_lea.sflag [#allocation5], %s985_s27 }
  0x41   : > { %p1075_p11 = scmp.ne.s32.totalorder %s1070_s6, 0  ;;  %s844_s21 = smov [#allocation6]  }
  0x44   : > { %720 = vset.pattern.permute.xlu0 %v838_v1 }
  0xba   : > { %v351_v5 = vpop.permute.xlu0 %350  ;;  %v346_v14 = vpop.permute.xlu1 %345 }
  0xbb   : > { %v353_v6 = vmul.f32 %v351_v5, %v341_v4  ;;  %v354_v9 = vmul.f32 %v351_v5, %v342_v7  ;;  %v348_v18 = vmul.f32 %v346_v14, %v341_v4 }
  0xbd   : > { %357 = vrot.lane.b32.xlu1 %v353_v6, %s841_s9 }
  0xbf   : > { %v367_v10 = vpop.permute.xlu0 %366 }
  0xc0   : > { %v369_v11 = vmul.f32 %v367_v10, %v341_v4  ;;  %v370_v12 = vmul.f32 %v367_v10, %v342_v7 }
  0xc1   : > { %359 = vrot.lane.b32.xlu1 %v354_v9, %s841_s9  ;;  %s752_s9 = scalar_lea.vmem %s1014_s24, 128 }
  0xc2   : > { %373 = vrot.lane.b32.xlu0 %v369_v11, %s842_s13  ;;  %p753_p8 = scmp.ne.s32.totalorder %s1014_s24, %s752_s9 }
  0xc4   : > { %p754_p0 = pnand %p753_p8, %p1075_p11 }
  0xc5   : > { %375 = vrot.lane.b32.xlu1 %v370_v12, %s842_s13  ;;  %s756_s13 = sshll.u32 %s844_s21, 4  ;;  %s757_s13 = int_to_ptr.vmem [resolvable:$false] %s756_s13 }
  0xc6   : > { %387 = vperm.xlu0 %720, %v384_v13   ;;  %p755_p7 = pneg %p754_p0  ;;  %s758_s14 = scalar_lea.vmem %s757_s13, 256 }
  0xc7   : > { %p759_p13 = scmp.lt.s32.totalorder %s1014_s24, %s757_s13  ;;  %p760_p3 = scmp.lt.s32.totalorder %s758_s14, %s752_s9 }
  0xc9   : > { %p761_p6 = por %p760_p3, %p759_p13 }
  0xcb   : > { %p762_p4 = pnand %p761_p6, %p755_p7 }
 0x12f   : > { %v358_v15 = vpop.permute.xlu1 %357 }
 0x133   : > { %v360_v16 = vpop.permute.xlu1 %359 }
 0x134   : > { %v362_v17 = vsel %vm361_vm1, %v358_v15, %v360_v16  ;;  %v374_v19 = vpop.permute.xlu0 %373 }
 0x135   : > { %v364_v20 = vadd.f32 %v362_v17, %v348_v18 }
 0x137   : > { %v376_v21 = vpop.permute.xlu1 %375 }
 0x138   : > { %v378_v22 = vsel %vm377_vm2, %v374_v19, %v376_v21 }
 0x139   : > { %v380_v23 = vadd.f32 %v378_v22, %v364_v20 }
 0x13b   : > { %381 = vst [vmem:[#allocation2] sm:$0xf] %v380_v23 }
 0x142   : > { %v383_v25 = vld [vmem:[#allocation2] sm:$0xf] }
 0x143   : > { %644 = vmatpush3.msk.msra.mxu0 %vm394_vm3, %v383_v25 }
 0x144   : > { %646 = vmatmul.mubr.msk.f32.vlgmr.msra.gmra.mrb[0].mxu0 %vm390_vm4, %v382_v24 }
 0x145   : > { %v388_v26 = vpop.permute.xlu0 %387 }
 0x217   : > { %v464_v27 = vpop.f32.mrb[0].mxu0 }
 0x218   : > { %v465_v28 = vadd.f32 %v464_v27, %v388_v26  ;;  %v647_v29 = vpop.f32.mrb[1].mxu0 }
 0x21a   : > { %468 = vst [vmem:[%s318_s17] sm:$0xff] %v465_v28 }
 0x21b   : > { %765 = shalt.err (!%p762_p4)
}
 0x21c   : > { %s766_s27 = scalar_lea.hbm %s1012_s11, 128  ;;  %s770_s10 = scalar_lea.hbm %s1066_s5, 256 }
 0x21d   : > { %p767_p10 = scmp.ne.s32.totalorder %s1012_s11, %s766_s27  ;;  %p771_p2 = scmp.lt.u32.totalorder %s1012_s11, %s1066_s5 }
 0x21e   : > { %p772_p5 = scmp.lt.u32.totalorder %s770_s10, %s766_s27  ;;  %p774_p8 = scmp.lt.u32.totalorder %s766_s27, %s1012_s11 }
 0x21f   : > { %p768_p12 = pnand %p767_p10, %p1075_p11 }
 0x220   : > { %p773_p9 = por %p772_p5, %p771_p2 }
 0x221   : > { %p769_p1 = pneg %p768_p12 }
 0x222   : > { %p775_p0 = por %p774_p8, %p773_p9 }
 0x224   : > { %p776_p7 = pnand %p775_p0, %p769_p1 }
 0x226   : > { %779 = shalt.err (!%p776_p7)
}
 0x227   : > { %650 = dma.vmem_to_hbm [thread:$0]  (%p1075_p11), %s1014_s24, 128, %s1012_s11, %s470_s12  }
 0x228 PF: > { %s497_s17 = sand.u32 1, %s814_s18   ;;  %p1076_p13 = scmp.ne.s32.totalorder %s1071_s8, 0 }
 0x229   : > { %p1077_p3 = scmp.ge.s32.totalorder %s834_s23, 2  ;;  %s498_s30 = scalar_lea.sflag [#allocation5], %s497_s17 }
 0x22b   : > { %p657_p6 = pnand %p1077_p3, %p1076_p13 }
 0x22d   : > { %809 = dma.done.wait (!%p657_p6), %s498_s30, 128  }
 0x22e   : > { %811 = vsyncadd (!%p657_p6), %s498_s30, 4294967168  ;;  %s21_s23 = sadd.s32 1, %s834_s23   ;;  %s1078_s18 = smov %s818_s19 }
 0x22f   : > { %p18_p4 = scmp.ge.s32.totalorder %s21_s23, 4   ;;  %s1079_s19 = smov %s822_s20 }
 0x230   : > { %s1080_s20 = smov %s931_s7  ;;  %s1081_s21 = smov %s830_s22 }
 0x231   : > { %s1082_s22 = smov %s1084_s26  ;;  %20 = sbr.rel (!%p18_p4) target bundleno = 6 (0x6), region = 98 }
 0x238   :  { %503 = vsyncpa [#allocation4], 1 }
 0x239   :  { %505 = vsyncpa [#allocation4 + $0x1], 1 }
 0x23a   :  { %506 = vsyncpa [#allocation5], 1 }
 0x23b   :  { %508 = vsyncpa [#allocation5 + $0x1], 1 }

</bundles_post_ra>
